<compile_context>
chip_gen: v7x
topology: tpu7x:2x2x1
jax: 0.10.0
libtpu: 0.0.40
codegen_flags: <defaults>
</compile_context>

<pallas_src>
import jax
import jax.numpy as jnp
from jax.experimental import pallas as pl
from jax.experimental.pallas import tpu as pltpu


def mlp_kernel(x_ref, w1_ref, b1_ref, w2_ref, b2_ref, w3_ref, b3_ref, o_ref):
    x = x_ref[...]                                                      # (13, TB)
    # hidden1 + ReLU
    h1 = jnp.dot(w1_ref[...], x, preferred_element_type=jnp.float32,
                 precision=jax.lax.Precision.HIGHEST)                   # (10, TB)
    h1 = jnp.maximum(h1 + b1_ref[...], 0.0)
    # hidden2 + ReLU
    h2 = jnp.dot(w2_ref[...], h1, preferred_element_type=jnp.float32,
                 precision=jax.lax.Precision.HIGHEST)                   # (10, TB)
    h2 = jnp.maximum(h2 + b2_ref[...], 0.0)
    # regression head
    out = jnp.dot(w3_ref[...], h2, preferred_element_type=jnp.float32,
                  precision=jax.lax.Precision.HIGHEST)                  # (1, TB)
    o_ref[...] = (out + b3_ref[...]).astype(o_ref.dtype)


def _round_up(n, m):
    return ((n + m - 1) // m) * m


_LANE = 128
_TB_MIN = 8 * 1024      # amortize ~0.35us fixed per-step overhead
_TB_CAP = 64 * 1024     # ~20 MiB live VMEM/step -> safe on v7x (64 MiB VMEM)
_TARGET_STEPS = 8       # >=4 grid steps at large B: both v7x TCs + DB overlap


def _pick_tb(B):
    """Batch tile (lane count). Large enough to hide per-step overhead, small
    enough for v7x VMEM, and long-grid enough for megacore sharding."""
    b128 = _round_up(B, _LANE)
    tb = b128 // _TARGET_STEPS
    tb = max(tb, _TB_MIN)
    tb = min(tb, _TB_CAP)
    tb = _round_up(tb, _LANE)
    tb = min(tb, b128)          # never over-pad tiny batches
    return tb


def mlp_forward(x, w1, b1, w2, b2, w3, b3, *, tb=None, x_feature_major=False):
    """Forward pass identical to the PyTorch MLPmodel.

    x: (B, 13) float — or (13, B) if x_feature_major=True (preferred for
       large B: avoids the wrapper transpose, a second full HBM pass over x).
    w*: PyTorch-convention (out, in); b*: (out,).
    Returns (B, 1) float32.
    """
    if x_feature_major:
        F, B = x.shape
    else:
        B, F = x.shape
    assert F == 13

    if tb is None:
        tb = _pick_tb(B)
    tb = min(_round_up(tb, _LANE), _round_up(B, _LANE))
    Bp = _round_up(B, tb)

    # Glue (plain XLA, outside the kernel): batch on lanes, pad only if needed.
    x32 = x.astype(jnp.float32)
    xT = x32 if x_feature_major else x32.T                  # (13, B)
    if Bp != B:
        xT = jnp.pad(xT, ((0, 0), (0, Bp - B)))             # (13, Bp)
    b1c = b1[:, None]                                        # (10, 1)
    b2c = b2[:, None]                                        # (10, 1)
    b3c = b3[:, None]                                        # (1, 1)

    # Weights/biases stay resident in VMEM across grid steps.
    resident = lambda a: pl.BlockSpec(a.shape, lambda i: (0, 0))

    out = pl.pallas_call(
        mlp_kernel,
        out_shape=jax.ShapeDtypeStruct((1, Bp), jnp.float32),
        grid_spec=pl.GridSpec(
            grid=(Bp // tb,),
            in_specs=[
                pl.BlockSpec((13, tb), lambda i: (0, i)),    # x tile (batch on lanes)
                resident(w1), resident(b1c),
                resident(w2), resident(b2c),
                resident(w3), resident(b3c),
            ],
            out_specs=pl.BlockSpec((1, tb), lambda i: (0, i)),
        ),
        compiler_params=pltpu.CompilerParams(
            dimension_semantics=("parallel",),
            # Large tiles need more than the default scoped VMEM on v5e (16 MiB)
            # and v6e (32 MiB); 48 MiB is inside every generation's physical VMEM
            # (v7x: 64 MiB) and leaves headroom for compiler scratch.
            vmem_limit_bytes=48 << 20,
        ),
    )(xT, w1, b1c, w2, b2c, w3, b3c)

    # Drop padded batch columns, return PyTorch-shaped (B, 1).
    return out[:, :B].T


def init_params(key):
    """Deterministic init matching nn.Linear shapes (kaiming-uniform-ish)."""
    ks = jax.random.split(key, 6)

    def linear(kw, kb, fan_in, fan_out):
        bound = 1.0 / jnp.sqrt(fan_in)
        w = jax.random.uniform(kw, (fan_out, fan_in), jnp.float32, -bound, bound)
        b = jax.random.uniform(kb, (fan_out,), jnp.float32, -bound, bound)
        return w, b

    w1, b1 = linear(ks[0], ks[1], 13, 10)
    w2, b2 = linear(ks[2], ks[3], 10, 10)
    w3, b3 = linear(ks[4], ks[5], 10, 1)
    return w1, b1, w2, b2, w3, b3


def _ref_forward(x, w1, b1, w2, b2, w3, b3):
    h = jnp.maximum(x @ w1.T + b1, 0.0)
    h = jnp.maximum(h @ w2.T + b2, 0.0)
    return h @ w3.T + b3


if __name__ == "__main__":
    key = jax.random.PRNGKey(0)
    kx, kx2, kp = jax.random.split(key, 3)
    w1, b1, w2, b2, w3, b3 = init_params(kp)

    # Small batch (single grid step, no pad removal path).
    B = 8
    x = jax.random.normal(kx, (B, 13), jnp.float32)
    out = jax.block_until_ready(mlp_forward(x, w1, b1, w2, b2, w3, b3))
    ref = _ref_forward(x, w1, b1, w2, b2, w3, b3)
    assert out.shape == (B, 1)
    assert jnp.allclose(out, ref, atol=1e-5, rtol=1e-5)

    # Ragged batch with an explicit small tile: exercises padding, a multi-step
    # grid (3 steps), and the "parallel" batch axis, still at small shapes.
    B2 = 300
    x2 = jax.random.normal(kx2, (B2, 13), jnp.float32)
    out2 = jax.block_until_ready(
        mlp_forward(x2, w1, b1, w2, b2, w3, b3, tb=128))
    ref2 = _ref_forward(x2, w1, b1, w2, b2, w3, b3)
    assert out2.shape == (B2, 1)
    assert jnp.allclose(out2, ref2, atol=1e-5, rtol=1e-5)

    # Feature-major producer path (no wrapper transpose).
    out3 = jax.block_until_ready(
        mlp_forward(x2.T, w1, b1, w2, b2, w3, b3, tb=128, x_feature_major=True))
    assert jnp.allclose(out3, ref2, atol=1e-5, rtol=1e-5)

    print("KERNEL_OK")
</pallas_src>

<mosaic_0001>
module attributes {stable_mosaic.version = 11 : i64} {
  func.func @mlp_kernel(%arg0: i32, %arg1: memref<13x128xf32, #tpu.memory_space<vmem>>, %arg2: memref<10x13xf32, #tpu.memory_space<vmem>>, %arg3: memref<10x1xf32, #tpu.memory_space<vmem>>, %arg4: memref<10x10xf32, #tpu.memory_space<vmem>>, %arg5: memref<10x1xf32, #tpu.memory_space<vmem>>, %arg6: memref<1x10xf32, #tpu.memory_space<vmem>>, %arg7: memref<1x1xf32, #tpu.memory_space<vmem>>, %arg8: memref<1x128xf32, #tpu.memory_space<vmem>>) attributes {dimension_semantics = [#tpu.dimension_semantics<parallel>], iteration_bounds = array<i64: 1>, scalar_prefetch = 0 : i64, scratch_operands = 0 : i64, tpu.core_type = #tpu.core_type<tc>, window_params = [{transform_indices = @transform_0, window_bounds = array<i64: 13, 128>}, {pipeline_mode = #tpu.pipeline_mode<synchronous>, transform_indices = @transform_1, window_bounds = array<i64: 10, 13>}, {pipeline_mode = #tpu.pipeline_mode<synchronous>, transform_indices = @transform_2, window_bounds = array<i64: 10, 1>}, {pipeline_mode = #tpu.pipeline_mode<synchronous>, transform_indices = @transform_3, window_bounds = array<i64: 10, 10>}, {pipeline_mode = #tpu.pipeline_mode<synchronous>, transform_indices = @transform_4, window_bounds = array<i64: 10, 1>}, {pipeline_mode = #tpu.pipeline_mode<synchronous>, transform_indices = @transform_5, window_bounds = array<i64: 1, 10>}, {pipeline_mode = #tpu.pipeline_mode<synchronous>, transform_indices = @transform_6, window_bounds = array<i64: 1, 1>}, {transform_indices = @transform_7, window_bounds = array<i64: 1, 128>}]} {
    %c0 = arith.constant 0 : index
    %c0_0 = arith.constant 0 : index
    %0 = vector.load %arg1[%c0, %c0_0] : memref<13x128xf32, #tpu.memory_space<vmem>>, vector<13x128xf32>
    %c0_1 = arith.constant 0 : index
    %c0_2 = arith.constant 0 : index
    %1 = vector.load %arg2[%c0_1, %c0_2] : memref<10x13xf32, #tpu.memory_space<vmem>>, vector<10x13xf32>
    %cst = arith.constant dense<0.000000e+00> : vector<10x128xf32>
    %2 = tpu.matmul %1, %0, %cst {dimension_numbers = #tpu.dot_dimension_numbers<[1], [0], [0], [1], [0, 0, 1, 1], [], []>, precision = #tpu.contract_precision<fp32>} : vector<10x13xf32>, vector<13x128xf32>, vector<10x128xf32> -> vector<10x128xf32>
    %c0_3 = arith.constant 0 : index
    %c0_4 = arith.constant 0 : index
    %3 = vector.load %arg3[%c0_3, %c0_4] : memref<10x1xf32, #tpu.memory_space<vmem>>, vector<10x1xf32>
    %4 = vector.broadcast %3 : vector<10x1xf32> to vector<10x128xf32>
    %5 = arith.addf %2, %4 : vector<10x128xf32>
    %cst_5 = arith.constant 0.000000e+00 : f32
    %6 = vector.broadcast %cst_5 : f32 to vector<10x128xf32>
    %7 = arith.maximumf %5, %6 : vector<10x128xf32>
    %c0_6 = arith.constant 0 : index
    %c0_7 = arith.constant 0 : index
    %8 = vector.load %arg4[%c0_6, %c0_7] : memref<10x10xf32, #tpu.memory_space<vmem>>, vector<10x10xf32>
    %cst_8 = arith.constant dense<0.000000e+00> : vector<10x128xf32>
    %9 = tpu.matmul %8, %7, %cst_8 {dimension_numbers = #tpu.dot_dimension_numbers<[1], [0], [0], [1], [0, 0, 1, 1], [], []>, precision = #tpu.contract_precision<fp32>} : vector<10x10xf32>, vector<10x128xf32>, vector<10x128xf32> -> vector<10x128xf32>
    %c0_9 = arith.constant 0 : index
    %c0_10 = arith.constant 0 : index
    %10 = vector.load %arg5[%c0_9, %c0_10] : memref<10x1xf32, #tpu.memory_space<vmem>>, vector<10x1xf32>
    %11 = vector.broadcast %10 : vector<10x1xf32> to vector<10x128xf32>
    %12 = arith.addf %9, %11 : vector<10x128xf32>
    %cst_11 = arith.constant 0.000000e+00 : f32
    %13 = vector.broadcast %cst_11 : f32 to vector<10x128xf32>
    %14 = arith.maximumf %12, %13 : vector<10x128xf32>
    %c0_12 = arith.constant 0 : index
    %c0_13 = arith.constant 0 : index
    %15 = vector.load %arg6[%c0_12, %c0_13] : memref<1x10xf32, #tpu.memory_space<vmem>>, vector<1x10xf32>
    %cst_14 = arith.constant dense<0.000000e+00> : vector<1x128xf32>
    %16 = tpu.matmul %15, %14, %cst_14 {dimension_numbers = #tpu.dot_dimension_numbers<[1], [0], [0], [1], [0, 0, 1, 1], [], []>, precision = #tpu.contract_precision<fp32>} : vector<1x10xf32>, vector<10x128xf32>, vector<1x128xf32> -> vector<1x128xf32>
    %c0_15 = arith.constant 0 : index
    %c0_16 = arith.constant 0 : index
    %17 = vector.load %arg7[%c0_15, %c0_16] : memref<1x1xf32, #tpu.memory_space<vmem>>, vector<1x1xf32>
    %18 = vector.broadcast %17 : vector<1x1xf32> to vector<1x128xf32>
    %19 = arith.addf %16, %18 : vector<1x128xf32>
    %c0_17 = arith.constant 0 : index
    %c0_18 = arith.constant 0 : index
    %20 = vector.load %arg8[%c0_17, %c0_18] : memref<1x128xf32, #tpu.memory_space<vmem>>, vector<1x128xf32>
    tpu.vector_store %arg8[%c0_17, %c0_18], %19 {strides = array<i32>} : memref<1x128xf32, #tpu.memory_space<vmem>>, vector<1x128xf32>,
    return
  }
  func.func @transform_0(%arg0: i32) -> (i32, i32) {
    %c0_i32 = arith.constant 0 : i32
    %c0_i32_0 = arith.constant 0 : i32
    return %c0_i32, %arg0 : i32, i32
  }
  func.func @transform_1(%arg0: i32) -> (i32, i32) {
    %c0_i32 = arith.constant 0 : i32
    %c0_i32_0 = arith.constant 0 : i32
    %c0_i32_1 = arith.constant 0 : i32
    return %c0_i32, %c0_i32_0 : i32, i32
  }
  func.func @transform_2(%arg0: i32) -> (i32, i32) {
    %c0_i32 = arith.constant 0 : i32
    %c0_i32_0 = arith.constant 0 : i32
    %c0_i32_1 = arith.constant 0 : i32
    return %c0_i32, %c0_i32_0 : i32, i32
  }
  func.func @transform_3(%arg0: i32) -> (i32, i32) {
    %c0_i32 = arith.constant 0 : i32
    %c0_i32_0 = arith.constant 0 : i32
    %c0_i32_1 = arith.constant 0 : i32
    return %c0_i32, %c0_i32_0 : i32, i32
  }
  func.func @transform_4(%arg0: i32) -> (i32, i32) {
    %c0_i32 = arith.constant 0 : i32
    %c0_i32_0 = arith.constant 0 : i32
    %c0_i32_1 = arith.constant 0 : i32
    return %c0_i32, %c0_i32_0 : i32, i32
  }
  func.func @transform_5(%arg0: i32) -> (i32, i32) {
    %c0_i32 = arith.constant 0 : i32
    %c0_i32_0 = arith.constant 0 : i32
    %c0_i32_1 = arith.constant 0 : i32
    return %c0_i32, %c0_i32_0 : i32, i32
  }
  func.func @transform_6(%arg0: i32) -> (i32, i32) {
    %c0_i32 = arith.constant 0 : i32
    %c0_i32_0 = arith.constant 0 : i32
    %c0_i32_1 = arith.constant 0 : i32
    return %c0_i32, %c0_i32_0 : i32, i32
  }
  func.func @transform_7(%arg0: i32) -> (i32, i32) {
    %c0_i32 = arith.constant 0 : i32
    %c0_i32_0 = arith.constant 0 : i32
    return %c0_i32, %arg0 : i32, i32
  }
}

</mosaic_0001>

<bundles_post_ra>
// kernel: tpu_custom_call.1
= control target key start
LH: loop header
LB: loop body
LE: loop exit
PB: predicated region body
PF: predicated region fallthrough
CT: control target
= control target key end

     0   :  { %s2014_s0 = inlined_call_operand.vmem [shape: f32[13,128], index: 0, kind: input, shape index: {}]   ;;  %s2015_s1 = inlined_call_operand.vmem [shape: f32[10,13], index: 1, kind: input, shape index: {}]   ;;  %s2016_s2 = inlined_call_operand.vmem [shape: f32[10,1], index: 2, kind: input, shape index: {}]   ;;  %s2017_s3 = inlined_call_operand.vmem [shape: f32[10,10], index: 3, kind: input, shape index: {}]   ;;  %s2018_s4 = inlined_call_operand.vmem [shape: f32[10,1], index: 4, kind: input, shape index: {}]   ;;  %s2019_s5 = inlined_call_operand.vmem [shape: f32[1,10], index: 5, kind: input, shape index: {}]   ;;  %s2020_s6 = inlined_call_operand.<no memory space> [shape: f32[1,1], index: 6, kind: input, shape index: {}]   ;;  %s2021_s7 = inlined_call_operand.hbm [shape: f32[1,128], index: 7, kind: output, shape index: {}]  }
   0x1   :  { %v12_v0 = vstv %s2020_s6 }
   0x2   :  { %13 = vst [vmem:[#allocation2] sm:$0x1] %v12_v0 }
   0x3   :  { %v29_v1 = vld [vmem:[%s2014_s0] sm:$0xff]  ;;  %v30_v2 = vld [vmem:[%s2014_s0 + $0x8] sm:$0x1f]  ;;  %vm52_vm0 = vcmask 1044480   ;;  %vm45_vm1 = vcmask 105472   ;;  %v1904_v11 = vmov 0  }
   0x4   :  { %v31_v3 = vld [vmem:[%s2015_s1] sm:$0xff]  ;;  %v54_v4 = vsel %vm52_vm0, %v30_v2, 0  ;;  %v57_v5 = vand.u32 4294901760, %v29_v1  ;;  %v32_v6 = vld [vmem:[%s2015_s1 + $0x8] sm:$0x3]  ;;  %1878 = vset.pattern.permute.xlu0 %v1904_v11  ;;  %1879 = vset.pattern.permute.xlu1 %v1904_v11 }
   0x5   :  { %v47_v7 = vsel %vm45_vm1, %v31_v3, 0  ;;  %v60_v8 = vand.u32 4294901760, %v54_v4  ;;  %v50_v9 = vsel %vm45_vm1, %v32_v6, 0  ;;  %v34_v12 = vld [vmem:[%s2016_s2 + $0x8] sm:$0x3] }
   0x6   :  { %v123_v10 = vand.u32 4294901760, %v47_v7  ;;  %v133_v13 = vand.u32 4294901760, %v50_v9  ;;  %v145_v14 = vsub.f32 %v29_v1, %v57_v5  ;;  %42 = vperm.xlu0 %1878, %v34_v12  }
   0x7   :  { %14 = vsyncpa [#allocation4], 0  ;;  %v1772_v15 = vpack.c.bf16 %v60_v8, %v57_v5  ;;  %v152_v17 = vsub.f32 %v54_v4, %v60_v8  ;;  %v33_v20 = vld [vmem:[%s2016_s2] sm:$0xff]  ;;  %vm574_vm2 = vcmask 80896   ;;  %v563_v43 = vld [vmem:[%s2018_s4 + $0x8] sm:$0x3] }
   0x8   :  { %v124_v16 = vsub.f32 %v47_v7, %v123_v10  ;;  %v134_v18 = vsub.f32 %v50_v9, %v133_v13  ;;  %v146_v19 = vand.u32 4294901760, %v145_v14  ;;  %v560_v36 = vld [vmem:[%s2017_s3] sm:$0xff]  ;;  %571 = vperm.xlu1 %1879, %v563_v43   ;;  %v561_v45 = vld [vmem:[%s2017_s3 + $0x8] sm:$0x3]  ;;  %vm581_vm3 = vcmask 1041408  }
   0x9   :  { %1785 = vmatprep.subr.bf16.mxu0 %v1772_v15  ;;  %1773 = vmatprep.subr.bf16.mxu1 %v1772_v15  ;;  %v153_v22 = vand.u32 4294901760, %v152_v17  ;;  %v1090_v32 = vld [vmem:[#allocation2] sm:$0x1]  ;;  %v1780_v35 = vpack.c.bf16 %v152_v17, %v145_v14  ;;  %v576_v37 = vsel %vm574_vm2, %v560_v36, 0  ;;  %v579_v46 = vsel %vm574_vm2, %v561_v45, 0 }
   0xa   :  { %v125_v21 = vand.u32 4294901760, %v124_v16  ;;  %1787 = vmatpush3.bf16.msra.mxu0 %v1772_v15  ;;  %1775 = vmatpush3.bf16.msra.mxu1 %v1772_v15  ;;  %v135_v23 = vand.u32 4294901760, %v134_v18  ;;  %v147_v24 = vsub.f32 %v145_v14, %v146_v19  ;;  %v1974_v38 = vand.u32 4294901760, %v576_v37  ;;  %v562_v44 = vld [vmem:[%s2018_s4] sm:$0xff] }
   0xb   :  { %v1788_v26 = vpack.c.bf16 %v153_v22, %v146_v19  ;;  %v154_v27 = vsub.f32 %v152_v17, %v153_v22  ;;  %37 = vperm.xlu0 %1878, %v33_v20   ;;  %v662_v48 = vand.u32 4294901760, %v579_v46  ;;  %vm1906_vm4 = vmmov 0   ;;  %v1089_v17 = vld [vmem:[%s2019_s5] sm:$0x1]  ;;  %s1908_s5 = smov [#allocation3]  }
   0xc   :  { %1671 = vmatprep.mubr.f32.mxu0 %v125_v21  ;;  %v126_v25 = vsub.f32 %v124_v16, %v125_v21  ;;  %v136_v28 = vsub.f32 %v134_v18, %v135_v23  ;;  %v148_v29 = vand.u32 4294901760, %v147_v24  ;;  %v653_v39 = vsub.f32 %v576_v37, %v1974_v38  ;;  %566 = vperm.xlu1 %1879, %v562_v44   ;;  %s1572_s19 = sshll.u32 %s1908_s5, 4  ;;  %s1573_s19 = int_to_ptr.vmem [resolvable:$true] %s1572_s19 }
   0xd   :  { %1672 = vmatmul.mubr.f32.vlgmr.msra.gmra.mrb[0].mxu0 %v135_v23  ;;  %1789 = vmatprep.subr.bf16.mxu0 %v1788_v26  ;;  %v155_v31 = vand.u32 4294901760, %v154_v27  ;;  %v663_v52 = vsub.f32 %v579_v46, %v662_v48  ;;  %s1880_s20 = scalar_lea.vmem %s1573_s19, 16  ;;  %s1884_s21 = scalar_lea.vmem %s1573_s19, 32 }
   0xe   :  { %v127_v30 = vand.u32 4294901760, %v126_v25  ;;  %v137_v33 = vand.u32 4294901760, %v136_v28  ;;  %1791 = vmatpush3.bf16.msra.mxu0 %v1788_v26  ;;  %1678 = vmatprep.mubr.f32.mxu0 %v123_v10  ;;  %v654_v40 = vand.u32 4294901760, %v653_v39  ;;  %p1881_p0 = scmp.ne.s32.totalorder %s1573_s19, %s1880_s20  ;;  %p1885_p1 = scmp.lt.s32.totalorder %s1573_s19, %s1573_s19 }
   0xf   :  { %v1776_v34 = vpack.c.bf16 %v155_v31, %v148_v29  ;;  %1793 = vmatprep.subr.bf16.mxu0 %v1772_v15  ;;  %1093 = vperm.xlu0 %1878, %v1090_v32   ;;  %v664_v59 = vand.u32 4294901760, %v663_v52  ;;  %p1886_p2 = scmp.lt.s32.totalorder %s1884_s21, %s1880_s20 }
  0x10   :  { %1650 = vmatprep.mubr.f32.mxu1 %v127_v30  ;;  %v655_v41 = vsub.f32 %v653_v39, %v654_v40 }
  0x11   :  { %1651 = vmatmul.mubr.f32.vlgmr.msra.gmra.mrb[0].mxu1 %v137_v33  ;;  %1777 = vmatprep.subr.bf16.mxu1 %v1776_v34  ;;  %v665_v1 = vsub.f32 %v663_v52, %v664_v59  ;;  %p1887_p3 = por %p1886_p2, %p1885_p1 }
  0x12   :  { %1657 = vmatprep.mubr.f32.mxu1 %v123_v10  ;;  %1779 = vmatpush3.bf16.msra.mxu1 %v1776_v34  ;;  %v656_v42 = vand.u32 4294901760, %v655_v41 }
  0x13   :  { %1781 = vmatprep.subr.bf16.mxu1 %v1780_v35  ;;  %v666_v5 = vand.u32 4294901760, %v665_v1  ;;  %p1888_p4 = pnand %p1887_p3, %p1881_p0 }
  0x15   :  { %1679 = vmatmul.mubr.f32.vlgmr.msra.gmra.mrb[0].mxu0 %v133_v13 }
  0x16   :  { %1795 = vmatpush3.bf16.msra.mxu0 %v1772_v15  ;;  %1685 = vmatprep.mubr.f32.mxu0 %v123_v10  ;;  %v1905_v15 = vmov 0.0|0.0  }
  0x17   :  { %1820 = vmatprep.subr.bf16.mxu0 %v1905_v15 }
  0x19   :  { %1658 = vmatmul.mubr.f32.vlgmr.msra.gmra.mrb[0].mxu1 %v133_v13 }
  0x1a   :  { %1783 = vmatpush3.bf16.msra.mxu1 %v1780_v35  ;;  %1664 = vmatprep.mubr.f32.mxu1 %v124_v16  ;;  %v1907_v16 = vmov 0.0  }
  0x1d   :  { %1686 = vmatmul.mubr.f32.vlgmr.msra.gmra.mrb[0].mxu0 %v133_v13 }
  0x1e   :  { %1734 = vmatprep.mubr.msk.f32.mxu0 %vm1906_vm4, %v1907_v16 }
  0x21   :  { %1665 = vmatmul.mubr.f32.vlgmr.msra.gmra.mrb[0].mxu1 %v134_v18  ;;  %v1101_v18 = vsel %vm574_vm2, %v1089_v17, 0 }
  0x22   :  { %1692 = vmatprep.mubr.f32.mxu1 %v656_v42  ;;  %v1173_v19 = vand.u32 4294901760, %v1101_v18 }
  0x24   :  { %v1174_v21 = vsub.f32 %v1101_v18, %v1173_v19 }
  0x26   :  { %v1175_v26 = vand.u32 4294901760, %v1174_v21 }
  0x28   :  { %v1176_v31 = vsub.f32 %v1174_v21, %v1175_v26 }
  0x2a   :  { %v1177_v37 = vand.u32 4294901760, %v1176_v31 }
  0x85   :  { %v43_v47 = vpop.permute.xlu0 %42 }
  0x87   :  { %v572_v20 = vpop.permute.xlu1 %571 }
  0x8a   :  { %v38_v53 = vpop.permute.xlu0 %37 }
  0x8b   :  { %v567_v23 = vpop.permute.xlu1 %566 }
  0xf0   :  { %v1687_v49 = vpop.f32.mrb[0].mxu0 }
  0xf1   :  { %v548_v50 = vpop.f32.mrb[1].mxu0 }
  0xf4   :  { %v1666_v51 = vpop.f32.mrb[0].mxu1 }
  0xf5   :  { %v1838_v54 = vadd.f32 %v1666_v51, %v43_v47  ;;  %v302_v55 = vpop.f32.mrb[1].mxu1  ;;  %v1096_v47 = vlaneseq }
  0xf6   :  { %v1840_v56 = vadd.f32 %v302_v55, %v38_v53 }
  0xf7   :  { %v1839_v57 = vadd.f32 %v1838_v54, %v1687_v49 }
  0xf8   :  { %v1841_v58 = vadd.f32 %v1840_v56, %v548_v50  ;;  %v1094_v50 = vpop.permute.xlu0 %1093 }
  0xf9   :  { %v559_v60 = vmax.f32 %v1839_v57, 0.0 }
  0xfa   :  { %v558_v61 = vmax.f32 %v1841_v58, 0.0 }
  0xfb   :  { %v583_v62 = vsel %vm581_vm3, %v559_v60, 0 }
  0xfc   :  { %v589_v63 = vand.u32 4294901760, %v583_v62  ;;  %v586_v0 = vand.u32 4294901760, %v558_v61 }
  0xfe   :  { %v681_v2 = vsub.f32 %v583_v62, %v589_v63  ;;  %v1796_v3 = vpack.c.bf16 %v589_v63, %v586_v0  ;;  %v674_v4 = vsub.f32 %v558_v61, %v586_v0 }
 0x100   :  { %1797 = vmatprep.subr.bf16.mxu1 %v1796_v3  ;;  %v675_v6 = vand.u32 4294901760, %v674_v4  ;;  %v682_v7 = vand.u32 4294901760, %v681_v2  ;;  %v1804_v8 = vpack.c.bf16 %v681_v2, %v674_v4 }
 0x101   :  { %1799 = vmatpush3.bf16.msra.mxu1 %v1796_v3 }
 0x102   :  { %v676_v9 = vsub.f32 %v674_v4, %v675_v6  ;;  %v683_v10 = vsub.f32 %v681_v2, %v682_v7  ;;  %v1812_v11 = vpack.c.bf16 %v682_v7, %v675_v6 }
 0x104   :  { %1693 = vmatmul.mubr.f32.vlgmr.msra.gmra.mrb[2].mxu1 %v666_v5  ;;  %v677_v12 = vand.u32 4294901760, %v676_v9  ;;  %v684_v13 = vand.u32 4294901760, %v683_v10 }
 0x105   :  { %1699 = vmatprep.mubr.f32.mxu1 %v1974_v38 }
 0x106   :  { %v1800_v14 = vpack.c.bf16 %v684_v13, %v677_v12 }
 0x108   :  { %1801 = vmatprep.subr.bf16.mxu1 %v1800_v14 }
 0x109   :  { %1803 = vmatpush3.bf16.msra.mxu1 %v1800_v14 }
 0x10a   :  { %1805 = vmatprep.subr.bf16.mxu1 %v1804_v8 }
 0x10c   :  { %1700 = vmatmul.mubr.f32.vlgmr.msra.gmra.mrb[2].mxu1 %v662_v48 }
 0x10d   :  { %1807 = vmatpush3.bf16.msra.mxu1 %v1804_v8  ;;  %1706 = vmatprep.mubr.f32.mxu1 %v653_v39 }
 0x10e   :  { %1809 = vmatprep.subr.bf16.mxu1 %v1796_v3 }
 0x114   :  { %1707 = vmatmul.mubr.f32.vlgmr.msra.gmra.mrb[2].mxu1 %v663_v52 }
 0x115   :  { %1811 = vmatpush3.bf16.msra.mxu1 %v1796_v3  ;;  %1713 = vmatprep.mubr.f32.mxu1 %v654_v40 }
 0x116   :  { %1813 = vmatprep.subr.bf16.mxu1 %v1812_v11 }
 0x11c   :  { %1714 = vmatmul.mubr.f32.vlgmr.msra.gmra.mrb[2].mxu1 %v664_v59 }
 0x11d   :  { %1815 = vmatpush3.bf16.msra.mxu1 %v1812_v11  ;;  %1720 = vmatprep.mubr.f32.mxu1 %v1974_v38 }
 0x11e   :  { %1817 = vmatprep.subr.bf16.mxu1 %v1796_v3 }
 0x124   :  { %1721 = vmatmul.mubr.f32.vlgmr.msra.gmra.mrb[2].mxu1 %v662_v48 }
 0x125   :  { %1819 = vmatpush3.bf16.msra.mxu1 %v1796_v3  ;;  %1727 = vmatprep.mubr.f32.mxu1 %v1974_v38 }
 0x12c   :  { %1728 = vmatmul.mubr.f32.vlgmr.msra.gmra.mrb[2].mxu1 %v662_v48  ;;  %v1097_v48 = vshrl.u32 %v1096_v47, 7 }
 0x12e   :  { %v1098_v49 = vsub.s32 0, %v1097_v48 }
 0x130   :  { %v1099_v51 = vrot.slane %v1094_v50, %v1098_v49 }
 0x1ff   :  { %v1729_v22 = vpop.f32.mrb[2].mxu1 }
 0x200   :  { %v1842_v24 = vadd.f32 %v1729_v22, %v572_v20  ;;  %v1077_v25 = vpop.f32.mrb[3].mxu1 }
 0x201   :  { %v1843_v27 = vadd.f32 %v1077_v25, %v567_v23 }
 0x202   :  { %v1088_v28 = vmax.f32 %v1842_v24, 0.0 }
 0x203   :  { %v1087_v29 = vmax.f32 %v1843_v27, 0.0 }
 0x204   :  { %v1104_v30 = vsel %vm581_vm3, %v1088_v28, 0 }
 0x205   :  { %v1110_v32 = vand.u32 4294901760, %v1104_v30  ;;  %v1107_v33 = vand.u32 4294901760, %v1087_v29 }
 0x207   :  { %v1192_v34 = vsub.f32 %v1104_v30, %v1110_v32  ;;  %v1821_v35 = vpack.c.bf16 %v1110_v32, %v1107_v33  ;;  %v1185_v36 = vsub.f32 %v1087_v29, %v1107_v33 }
 0x209   :  { %v1193_v38 = vand.u32 4294901760, %v1192_v34  ;;  %v1186_v39 = vand.u32 4294901760, %v1185_v36  ;;  %1822 = vmatpush3.bf16.msra.mxu0 %v1821_v35  ;;  %v1827_v40 = vpack.c.bf16 %v1192_v34, %v1185_v36 }
 0x20a   :  { %1823 = vmatprep.subr.bf16.mxu0 %v1905_v15 }
 0x20b   :  { %v1194_v41 = vsub.f32 %v1192_v34, %v1193_v38  ;;  %v1187_v42 = vsub.f32 %v1185_v36, %v1186_v39  ;;  %v1833_v43 = vpack.c.bf16 %v1193_v38, %v1186_v39 }
 0x20c   :  { %1735 = vmatmul.mubr.f32.vlgmr.msra.gmra.mrb[2].mxu0 %v1177_v37 }
 0x20d   :  { %v1195_v44 = vand.u32 4294901760, %v1194_v41  ;;  %v1188_v45 = vand.u32 4294901760, %v1187_v42  ;;  %1741 = vmatprep.mubr.msk.f32.mxu0 %vm1906_vm4, %v1907_v16 }
 0x20f   :  { %v1824_v46 = vpack.c.bf16 %v1195_v44, %v1188_v45 }
 0x211   :  { %1825 = vmatpush3.bf16.msra.mxu0 %v1824_v46 }
 0x212   :  { %1826 = vmatprep.subr.bf16.mxu0 %v1905_v15 }
 0x214   :  { %1742 = vmatmul.mubr.f32.vlgmr.msra.gmra.mrb[2].mxu0 %v1173_v19 }
 0x215   :  { %1828 = vmatpush3.bf16.msra.mxu0 %v1827_v40  ;;  %1748 = vmatprep.mubr.msk.f32.mxu0 %vm1906_vm4, %v1907_v16 }
 0x216   :  { %1829 = vmatprep.subr.bf16.mxu0 %v1905_v15 }
 0x21c   :  { %1749 = vmatmul.mubr.f32.vlgmr.msra.gmra.mrb[2].mxu0 %v1174_v21 }
 0x21d   :  { %1831 = vmatpush3.bf16.msra.mxu0 %v1821_v35  ;;  %1755 = vmatprep.mubr.msk.f32.mxu0 %vm1906_vm4, %v1907_v16 }
 0x21e   :  { %1832 = vmatprep.subr.bf16.mxu0 %v1905_v15 }
 0x224   :  { %1756 = vmatmul.mubr.f32.vlgmr.msra.gmra.mrb[2].mxu0 %v1175_v26 }
 0x225   :  { %1834 = vmatpush3.bf16.msra.mxu0 %v1833_v43  ;;  %1762 = vmatprep.mubr.msk.f32.mxu0 %vm1906_vm4, %v1907_v16 }
 0x226   :  { %1835 = vmatprep.subr.bf16.mxu0 %v1905_v15 }
 0x22c   :  { %1763 = vmatmul.mubr.f32.vlgmr.msra.gmra.mrb[2].mxu0 %v1173_v19 }
 0x22d   :  { %1837 = vmatpush3.bf16.msra.mxu0 %v1821_v35  ;;  %1769 = vmatprep.mubr.msk.f32.mxu0 %vm1906_vm4, %v1907_v16 }
 0x234   :  { %1770 = vmatmul.mubr.f32.vlgmr.msra.gmra.mrb[2].mxu0 %v1173_v19 }
 0x307   :  { %v1561_v52 = vpop.f32.mrb[2].mxu0 }
 0x308   :  { %v1844_v53 = vadd.f32 %v1561_v52, %v1099_v51  ;;  %v1771_v54 = vpop.f32.mrb[3].mxu0 }
 0x30a   :  { %1565 = vst [vmem:[#allocation3] sm:$0x1] %v1844_v53 }
 0x30b   :  { %1891 = shalt.err (!%p1888_p4)
}
 0x30c   :  { %s1892_s24 = scalar_lea.hbm %s2021_s7, 16 }
 0x30d   :  { %p1893_p5 = scmp.ne.s32.totalorder %s2021_s7, %s1892_s24  ;;  %p1896_p6 = scmp.lt.u32.totalorder %s1892_s24, %s2021_s7 }
 0x30f   :  { %p1898_p7 = pnand %p1896_p6, %p1893_p5 }
 0x311   :  { %1901 = shalt.err (!%p1898_p7)
}
 0x312   :  { %1575 = dma.vmem_to_hbm [thread:$0]  %s1573_s19, 16, %s2021_s7, [#allocation4]  }
 0x313   :  { %1902 = dma.done.wait [#allocation4], 16  }
 0x314   :  { %1903 = vsyncadd [#allocation4], 4294967280 }
 0x315   :  { %1579 = vsyncpa [#allocation4], 1 }

</bundles_post_ra>
